<compile_context>
chip_gen: v5e
topology: v5e:2x2
jax: 0.10.0
libtpu: 0.0.40
codegen_flags: <defaults>
</compile_context>

<pallas_src>
import jax
import jax.numpy as jnp
from jax.experimental import pallas as pl
from jax.experimental.pallas import tpu as pltpu

_SUBLANE = 8
_LANE = 128


def _bbox_pred_kernel(x_ref, w_ref, b_ref, o_ref):
    # x_ref: (TILE_N, K) producer dtype; w_ref: (K, box_dim) bf16 (resident);
    # b_ref: (1, box_dim) f32 (resident); o_ref: (TILE_N, box_dim) f32.
    x = x_ref[...].astype(w_ref.dtype)                       # per-tile cast on the VPU (free)
    acc = jnp.dot(x, w_ref[...], preferred_element_type=jnp.float32)
    o_ref[...] = acc + b_ref[...]


def prepare_bbox_params(weight, bias, compute_dtype=jnp.bfloat16,
                        chw_shape=None, input_layout="NCHW"):
    """One-time parameter prep (hoisted out of the per-call path).

    weight: (box_dim, K) f32 in PyTorch nn.Linear layout (K flattened in C,H,W order);
    bias: (box_dim,) f32. If the on-device activations are NHWC, pass chw_shape=(C,H,W)
    and input_layout="NHWC": the column permutation is folded into the weight here
    (free, once) instead of transposing x every call.
    """
    box_dim, k = weight.shape
    w = jnp.asarray(weight)
    if input_layout == "NHWC":
        assert chw_shape is not None, "chw_shape=(C,H,W) required for NHWC layout"
        c, h, wd = chw_shape
        w = w.reshape(box_dim, c, h, wd).transpose(0, 2, 3, 1).reshape(box_dim, k)
    w_t = w.T.astype(compute_dtype)                          # (K, box_dim)
    b2d = jnp.asarray(bias, jnp.float32).reshape(1, box_dim)
    return w_t, b2d


def _round_up(x, m):
    return ((x + m - 1) // m) * m


def _vmem_budget_bytes():
    """Generation-aware scoped-VMEM budget (also passed as vmem_limit_bytes)."""
    cap = 64 * 1024 * 1024                                   # conservative fallback (v7x per-TC)
    try:
        info = pltpu.get_tpu_info()
        cap = int(getattr(info, "vmem_capacity_bytes", cap)) or cap
    except Exception:
        pass
    # 60% of physical, capped at 48 MiB: safe on v5e/v6e (128 MiB) and v7x (64 MiB/TC).
    return min(int(cap * 0.6), 48 * 1024 * 1024)


def _pick_tile_n(n, k, x_itemsize, w_itemsize, budget):
    """Largest row tile whose double-buffered footprint fits the budget."""
    # Narrow (<128) minor dims occupy a full 128-lane tile in VMEM — count conservatively.
    fixed = 2 * k * _LANE * w_itemsize + 2 * _SUBLANE * _LANE * 4    # weight + bias
    for cand in (8192, 4096, 2048, 1024, 512, 256, 128, 64, 32, 16, 8):
        need = (2 * cand * k * x_itemsize                    # double-buffered x tiles
                + 2 * cand * _LANE * 4                       # double-buffered f32 out tiles
                + fixed)
        if need <= budget:
            return cand
    return _SUBLANE


def bbox_pred_pallas(x2d, w_t, b2d, box_dim, *, tile_n=None):
    """x2d: (N, K) producer dtype; w_t: (K, box_dim); b2d: (1, box_dim). -> (N, box_dim) f32."""
    n, k = x2d.shape
    assert w_t.shape == (k, box_dim) and b2d.shape == (1, box_dim)
    x_itemsize = jnp.dtype(x2d.dtype).itemsize
    w_itemsize = jnp.dtype(w_t.dtype).itemsize
    budget = _vmem_budget_bytes()

    if n < _SUBLANE:
        # Block 2nd-minor dim == full array dim is legal; single whole-array block.
        tile_n = n
    else:
        if tile_n is None:
            tile_n = _pick_tile_n(n, k, x_itemsize, w_itemsize, budget)
        tile_n = min(tile_n, _round_up(n, _SUBLANE))         # don't over-allocate VMEM
        if n > 256:
            # Keep >= 2 grid steps so both TensorCores pull HBM on v7x.
            tile_n = min(tile_n, _round_up((n + 1) // 2, 256))
        tile_n = max(_SUBLANE, _round_up(tile_n, _SUBLANE))

    grid = (pl.cdiv(n, tile_n),)
    cost = pl.CostEstimate(
        flops=2 * n * k * box_dim,
        transcendentals=0,
        bytes_accessed=n * k * x_itemsize + k * box_dim * w_itemsize + n * box_dim * 4,
    )
    return pl.pallas_call(
        _bbox_pred_kernel,
        out_shape=jax.ShapeDtypeStruct((n, box_dim), jnp.float32),
        grid=grid,
        in_specs=[
            pl.BlockSpec((tile_n, k), lambda i: (i, 0)),     # streamed x row tiles
            pl.BlockSpec((k, box_dim), lambda i: (0, 0)),    # weight resident across grid
            pl.BlockSpec((1, box_dim), lambda i: (0, 0)),    # bias resident across grid
        ],
        out_specs=pl.BlockSpec((tile_n, box_dim), lambda i: (i, 0)),
        compiler_params=pltpu.CompilerParams(
            dimension_semantics=("parallel",),               # megacore sharding on v7x
            vmem_limit_bytes=int(budget)),
        cost_estimate=cost,
    )(x2d, w_t, b2d)


def box_reg_output_forward(x, w_t, b2d, box_dim, *,
                           min_rows_for_pallas=64, tile_n=None, force_pallas=False):
    """Equivalent of BoxRegOutput.forward(x) with pre-prepared parameters."""
    if x.ndim > 2:
        x = x.reshape(x.shape[0], -1)                        # torch.flatten(x, start_dim=1)
    if not force_pallas and x.shape[0] < min_rows_for_pallas:
        # GEMV-sized problem: pallas_call launch overhead dominates; XLA's fused path wins.
        acc = jnp.dot(x.astype(w_t.dtype), w_t, preferred_element_type=jnp.float32)
        return acc + b2d
    return bbox_pred_pallas(x, w_t, b2d, box_dim, tile_n=tile_n)

# TODO(synk): losses()/box_reg_loss()/predict_boxes() (box2box transform deltas,
# smooth-L1/IoU losses, ragged per-image splits) are not part of forward() and are
# left untranslated.


if __name__ == "__main__":
    key = jax.random.PRNGKey(0)
    kx, kw, kx2 = jax.random.split(key, 3)

    # Shapes consistent with the module: ShapeSpec(channels=4, height=16, width=16)
    # -> input_size = 1024, box_dim = 4 (len(Box2BoxTransform.weights)).
    N, C, H, W = 2, 4, 16, 16
    box_dim = 4
    input_size = C * H * W

    x = jax.random.normal(kx, (N, C, H, W), dtype=jnp.float32)

    # Parameter init matching the module: normal(std=0.001) weight, zero bias.
    weight = 0.001 * jax.random.normal(kw, (box_dim, input_size), dtype=jnp.float32)
    bias = jnp.zeros((box_dim,), dtype=jnp.float32)

    # One-time parameter preparation (transpose + bf16 cast).
    w_t, b2d = prepare_bbox_params(weight, bias)

    # --- 1) Module-spec tiny shape (N=2); force the Pallas path so the kernel runs. ---
    out = box_reg_output_forward(x, w_t, b2d, box_dim, force_pallas=True)
    out = jax.block_until_ready(out)
    assert out.shape == (N, box_dim)

    x2d = x.reshape(N, -1)
    w_bf = weight.T.astype(jnp.bfloat16)
    ref_bf16 = jnp.dot(x2d.astype(jnp.bfloat16), w_bf,
                       preferred_element_type=jnp.float32) + bias
    ref_f32 = x2d @ weight.T + bias
    assert jnp.allclose(out, ref_bf16, atol=2e-4, rtol=1e-3)
    assert jnp.allclose(out, ref_f32, atol=5e-3, rtol=5e-2)

    # --- 2) Realistic proposal count: row tiling, partial final block, multi-step grid. ---
    N2 = 1000
    xb = jax.random.normal(kx2, (N2, input_size), dtype=jnp.float32)
    out2 = bbox_pred_pallas(xb, w_t, b2d, box_dim, tile_n=256)   # grid=4, last block partial
    out2 = jax.block_until_ready(out2)
    ref2 = jnp.dot(xb.astype(jnp.bfloat16), w_bf,
                   preferred_element_type=jnp.float32) + bias
    assert out2.shape == (N2, box_dim)
    assert jnp.allclose(out2, ref2, atol=2e-4, rtol=1e-3)

    # --- 3) Auto tile pick / generation-aware VMEM budget path. ---
    out3 = bbox_pred_pallas(xb, w_t, b2d, box_dim)               # tile_n chosen from budget
    out3 = jax.block_until_ready(out3)
    assert jnp.allclose(out3, ref2, atol=2e-4, rtol=1e-3)

    print("KERNEL_OK")
</pallas_src>

<mosaic_0001>
module attributes {stable_mosaic.version = 11 : i64} {
  func.func @_bbox_pred_kernel(%arg0: i32, %arg1: memref<2x1024xf32, #tpu.memory_space<vmem>>, %arg2: memref<1024x4xbf16, #tpu.memory_space<vmem>>, %arg3: memref<1x4xf32, #tpu.memory_space<vmem>>, %arg4: memref<2x4xf32, #tpu.memory_space<vmem>>) attributes {dimension_semantics = [#tpu.dimension_semantics<parallel>], iteration_bounds = array<i64: 1>, scalar_prefetch = 0 : i64, scratch_operands = 0 : i64, tpu.core_type = #tpu.core_type<tc>, window_params = [{transform_indices = @transform_0, window_bounds = array<i64: 2, 1024>}, {pipeline_mode = #tpu.pipeline_mode<synchronous>, transform_indices = @transform_1, window_bounds = array<i64: 1024, 4>}, {pipeline_mode = #tpu.pipeline_mode<synchronous>, transform_indices = @transform_2, window_bounds = array<i64: 1, 4>}, {transform_indices = @transform_3, window_bounds = array<i64: 2, 4>}]} {
    %c0 = arith.constant 0 : index
    %c0_0 = arith.constant 0 : index
    %0 = vector.load %arg1[%c0, %c0_0] : memref<2x1024xf32, #tpu.memory_space<vmem>>, vector<2x1024xf32>
    %1 = arith.truncf %0 : vector<2x1024xf32> to vector<2x1024xbf16>
    %c0_1 = arith.constant 0 : index
    %c0_2 = arith.constant 0 : index
    %2 = vector.load %arg2[%c0_1, %c0_2] : memref<1024x4xbf16, #tpu.memory_space<vmem>>, vector<1024x4xbf16>
    %cst = arith.constant dense<0.000000e+00> : vector<2x4xf32>
    %3 = tpu.matmul %1, %2, %cst {dimension_numbers = #tpu.dot_dimension_numbers<[1], [0], [0], [1], [0, 0, 1, 1], [], []>} : vector<2x1024xbf16>, vector<1024x4xbf16>, vector<2x4xf32> -> vector<2x4xf32>
    %c0_3 = arith.constant 0 : index
    %c0_4 = arith.constant 0 : index
    %4 = vector.load %arg3[%c0_3, %c0_4] : memref<1x4xf32, #tpu.memory_space<vmem>>, vector<1x4xf32>
    %5 = vector.broadcast %4 : vector<1x4xf32> to vector<2x4xf32>
    %6 = arith.addf %3, %5 : vector<2x4xf32>
    %c0_5 = arith.constant 0 : index
    %c0_6 = arith.constant 0 : index
    %7 = vector.load %arg4[%c0_5, %c0_6] : memref<2x4xf32, #tpu.memory_space<vmem>>, vector<2x4xf32>
    tpu.vector_store %arg4[%c0_5, %c0_6], %6 {strides = array<i32>} : memref<2x4xf32, #tpu.memory_space<vmem>>, vector<2x4xf32>,
    return
  }
  func.func @transform_0(%arg0: i32) -> (i32, i32) {
    %c0_i32 = arith.constant 0 : i32
    %c0_i32_0 = arith.constant 0 : i32
    return %arg0, %c0_i32 : i32, i32
  }
  func.func @transform_1(%arg0: i32) -> (i32, i32) {
    %c0_i32 = arith.constant 0 : i32
    %c0_i32_0 = arith.constant 0 : i32
    %c0_i32_1 = arith.constant 0 : i32
    return %c0_i32, %c0_i32_0 : i32, i32
  }
  func.func @transform_2(%arg0: i32) -> (i32, i32) {
    %c0_i32 = arith.constant 0 : i32
    %c0_i32_0 = arith.constant 0 : i32
    %c0_i32_1 = arith.constant 0 : i32
    return %c0_i32, %c0_i32_0 : i32, i32
  }
  func.func @transform_3(%arg0: i32) -> (i32, i32) {
    %c0_i32 = arith.constant 0 : i32
    %c0_i32_0 = arith.constant 0 : i32
    return %arg0, %c0_i32 : i32, i32
  }
}

</mosaic_0001>

<bundles_post_ra>
// kernel: tpu_custom_call.1
= control target key start
LH: loop header
LB: loop body
LE: loop exit
PB: predicated region body
PF: predicated region fallthrough
CT: control target
= control target key end

     0   :  { %s1257_s0 = inlined_call_operand.vmem [shape: f32[2,1024], index: 0, kind: input, shape index: {}]   ;;  %s1258_s1 = inlined_call_operand.vmem [shape: bf16[1024,4], index: 1, kind: input, shape index: {}]   ;;  %s1259_s2 = inlined_call_operand.vmem [shape: f32[1,4], index: 2, kind: input, shape index: {}]   ;;  %s1260_s3 = inlined_call_operand.hbm [shape: f32[2,4], index: 3, kind: output, shape index: {}]  }
   0x1   :  { %v947_v0 = vld [vmem:[%s1258_s1 + $0x38] sm:$0xff]  ;;  %v946_v4 = vld [vmem:[%s1258_s1 + $0x30] sm:$0xff]  ;;  %v945_v8 = vld [vmem:[%s1258_s1 + $0x28] sm:$0xff] }
   0x2   :  { %v955_v1 = vld [vmem:[%s1258_s1 + $0x78] sm:$0xff]  ;;  %562 = vmatpush.bf16.msra.mxu0 %v947_v0  ;;  %v954_v5 = vld [vmem:[%s1258_s1 + $0x70] sm:$0xff]  ;;  %v953_v9 = vld [vmem:[%s1258_s1 + $0x68] sm:$0xff] }
   0x3   :  { %v963_v2 = vld [vmem:[%s1258_s1 + $0xb8] sm:$0xff]  ;;  %575 = vmatpush.bf16.msra.mxu1 %v955_v1  ;;  %v962_v6 = vld [vmem:[%s1258_s1 + $0xb0] sm:$0xff]  ;;  %v961_v10 = vld [vmem:[%s1258_s1 + $0xa8] sm:$0xff] }
   0x4   :  { %v971_v3 = vld [vmem:[%s1258_s1 + $0xf8] sm:$0xff]  ;;  %588 = vmatpush.bf16.msra.mxu2 %v963_v2  ;;  %v970_v7 = vld [vmem:[%s1258_s1 + $0xf0] sm:$0xff]  ;;  %v969_v11 = vld [vmem:[%s1258_s1 + $0xe8] sm:$0xff] }
   0x5   :  { %601 = vmatpush.bf16.msra.mxu3 %v971_v3  ;;  %v944_v12 = vld [vmem:[%s1258_s1 + $0x20] sm:$0xff]  ;;  %v943_v17 = vld [vmem:[%s1258_s1 + $0x18] sm:$0xff]  ;;  %v942_v21 = vld [vmem:[%s1258_s1 + $0x10] sm:$0xff] }
   0x6   :  { %563 = vmatpush.bf16.msra.mxu0 %v946_v4  ;;  %v952_v13 = vld [vmem:[%s1258_s1 + $0x60] sm:$0xff]  ;;  %v951_v18 = vld [vmem:[%s1258_s1 + $0x58] sm:$0xff]  ;;  %v950_v22 = vld [vmem:[%s1258_s1 + $0x50] sm:$0xff] }
   0x7   :  { %576 = vmatpush.bf16.msra.mxu1 %v954_v5  ;;  %v960_v14 = vld [vmem:[%s1258_s1 + $0xa0] sm:$0xff]  ;;  %v959_v19 = vld [vmem:[%s1258_s1 + $0x98] sm:$0xff] }
   0x8   :  { %589 = vmatpush.bf16.msra.mxu2 %v962_v6  ;;  %v968_v15 = vld [vmem:[%s1258_s1 + $0xe0] sm:$0xff]  ;;  %v967_v20 = vld [vmem:[%s1258_s1 + $0xd8] sm:$0xff] }
   0x9   :  { %602 = vmatpush.bf16.msra.mxu3 %v970_v7  ;;  %v15_v16 = vld [vmem:[%s1257_s0] sm:$0xff] }
   0xa   :  { %564 = vmatpush.bf16.msra.mxu0 %v945_v8  ;;  %19 = vst [vmem:[#allocation1] ss:$4 sm:$0xff] %v15_v16 }
   0xb   :  { %577 = vmatpush.bf16.msra.mxu1 %v953_v9 }
   0xc   :  { %590 = vmatpush.bf16.msra.mxu2 %v961_v10 }
   0xd   :  { %603 = vmatpush.bf16.msra.mxu3 %v969_v11 }
   0xe   :  { %565 = vmatpush.bf16.msra.mxu0 %v944_v12 }
   0xf   :  { %578 = vmatpush.bf16.msra.mxu1 %v952_v13 }
  0x10   :  { %591 = vmatpush.bf16.msra.mxu2 %v960_v14 }
  0x11   :  { %604 = vmatpush.bf16.msra.mxu3 %v968_v15 }
  0x12   :  { %566 = vmatpush.bf16.msra.mxu0 %v943_v17 }
  0x13   :  { %579 = vmatpush.bf16.msra.mxu1 %v951_v18 }
  0x14   :  { %8 = vsyncpa [#allocation3], 0  ;;  %592 = vmatpush.bf16.msra.mxu2 %v959_v19  ;;  %v958_v23 = vld [vmem:[%s1258_s1 + $0x90] sm:$0xff]  ;;  %v941_v25 = vld [vmem:[%s1258_s1 + $0x8] sm:$0xff]  ;;  %s1032_s7 = smov [#allocation2]   ;;  %s675_s11 = sshll.u32 %s1260_s3, 4  ;;  %s676_s11 = int_to_ptr.hbm [resolvable:$true] %s675_s11 }
  0x15   :  { %605 = vmatpush.bf16.msra.mxu3 %v967_v20  ;;  %v966_v24 = vld [vmem:[%s1258_s1 + $0xd0] sm:$0xff]  ;;  %v949_v26 = vld [vmem:[%s1258_s1 + $0x48] sm:$0xff]  ;;  %v940_v30 = vld [vmem:[%s1258_s1] sm:$0xff]  ;;  %s673_s8 = sshll.u32 %s1032_s7, 4  ;;  %vm666_vm0 = vcmask 25600   ;;  %s674_s8 = int_to_ptr.vmem [resolvable:$true] %s673_s8 }
  0x16   :  { %567 = vmatpush.bf16.msra.mxu0 %v942_v21  ;;  %v957_v27 = vld [vmem:[%s1258_s1 + $0x88] sm:$0xff]  ;;  %v948_v31 = vld [vmem:[%s1258_s1 + $0x40] sm:$0xff]  ;;  %v979_v34 = vld [vmem:[%s1258_s1 + $0x138] sm:$0xff] }
  0x17   :  { %580 = vmatpush.bf16.msra.mxu1 %v950_v22  ;;  %v965_v28 = vld [vmem:[%s1258_s1 + $0xc8] sm:$0xff]  ;;  %v956_v32 = vld [vmem:[%s1258_s1 + $0x80] sm:$0xff]  ;;  %v987_v35 = vld [vmem:[%s1258_s1 + $0x178] sm:$0xff] }
  0x18   :  { %593 = vmatpush.bf16.msra.mxu2 %v958_v23  ;;  %v16_v29 = vld [vmem:[%s1257_s0 + $0x8] sm:$0xff]  ;;  %v964_v33 = vld [vmem:[%s1258_s1 + $0xc0] sm:$0xff]  ;;  %v24_v36 = vld.sshfl [vmem:[#allocation1 + $0x10] sm:$0xff pattern:$0x73625140] }
  0x19   :  { %606 = vmatpush.bf16.msra.mxu3 %v966_v24  ;;  %21 = vst [vmem:[#allocation1 + $0x20] ss:$4 sm:$0xff] %v16_v29  ;;  %v25_v37 = vld.sshfl [vmem:[#allocation1 + $0x18] sm:$0xff pattern:$0x73625140]  ;;  %v40_v42 = vpack.c.bf16 %v24_v36, %v24_v36  ;;  %v978_v46 = vld [vmem:[%s1258_s1 + $0x130] sm:$0xff] }
  0x1a   :  { %568 = vmatpush.bf16.msra.mxu0 %v941_v25  ;;  %v22_v38 = vld.sshfl [vmem:[#allocation1] sm:$0xff pattern:$0x73625140]  ;;  %v23_v39 = vld.sshfl [vmem:[#allocation1 + $0x8] sm:$0xff pattern:$0x73625140]  ;;  %v41_v43 = vpack.c.bf16 %v25_v37, %v25_v37 }
  0x1b   :  { %581 = vmatpush.bf16.msra.mxu1 %v949_v26  ;;  %v995_v40 = vld [vmem:[%s1258_s1 + $0x1b8] sm:$0xff]  ;;  %v38_v44 = vpack.c.bf16 %v22_v38, %v22_v38  ;;  %v39_v45 = vpack.c.bf16 %v23_v39, %v23_v39  ;;  %v986_v47 = vld [vmem:[%s1258_s1 + $0x170] sm:$0xff]  ;;  %v977_v50 = vld [vmem:[%s1258_s1 + $0x128] sm:$0xff] }
  0x1c   :  { %594 = vmatpush.bf16.msra.mxu2 %v957_v27  ;;  %v1003_v41 = vld [vmem:[%s1258_s1 + $0x1f8] sm:$0xff]  ;;  %v994_v48 = vld [vmem:[%s1258_s1 + $0x1b0] sm:$0xff]  ;;  %v985_v51 = vld [vmem:[%s1258_s1 + $0x168] sm:$0xff] }
  0x1d   :  { %607 = vmatpush.bf16.msra.mxu3 %v965_v28  ;;  %v1002_v49 = vld [vmem:[%s1258_s1 + $0x1f0] sm:$0xff]  ;;  %v993_v52 = vld [vmem:[%s1258_s1 + $0x1a8] sm:$0xff]  ;;  %v976_v54 = vld [vmem:[%s1258_s1 + $0x120] sm:$0xff] }
  0x1e   :  { %569 = vmatpush.bf16.msra.mxu0 %v940_v30  ;;  %v1001_v53 = vld [vmem:[%s1258_s1 + $0x1e8] sm:$0xff]  ;;  %v984_v55 = vld [vmem:[%s1258_s1 + $0x160] sm:$0xff]  ;;  %v975_v58 = vld [vmem:[%s1258_s1 + $0x118] sm:$0xff] }
  0x1f   :  { %582 = vmatpush.bf16.msra.mxu1 %v948_v31  ;;  %v992_v56 = vld [vmem:[%s1258_s1 + $0x1a0] sm:$0xff]  ;;  %v983_v59 = vld [vmem:[%s1258_s1 + $0x158] sm:$0xff]  ;;  %v974_v62 = vld [vmem:[%s1258_s1 + $0x110] sm:$0xff] }
  0x20   :  { %595 = vmatpush.bf16.msra.mxu2 %v956_v32  ;;  %v1000_v57 = vld [vmem:[%s1258_s1 + $0x1e0] sm:$0xff]  ;;  %v991_v60 = vld [vmem:[%s1258_s1 + $0x198] sm:$0xff]  ;;  %v982_v63 = vld [vmem:[%s1258_s1 + $0x150] sm:$0xff] }
  0x21   :  { %608 = vmatpush.bf16.msra.mxu3 %v964_v33  ;;  %570 = vmatmul.bf16.vlgmr.msra.gmra.mxu0 %v38_v44  ;;  %v999_v61 = vld [vmem:[%s1258_s1 + $0x1d8] sm:$0xff]  ;;  %v990_v0 = vld [vmem:[%s1258_s1 + $0x190] sm:$0xff]  ;;  %v973_v2 = vld [vmem:[%s1258_s1 + $0x108] sm:$0xff] }
  0x22   :  { %614 = vmatpush.bf16.msrb.mxu0 %v979_v34  ;;  %583 = vmatmul.bf16.vlgmr.msra.gmra.mxu1 %v39_v45  ;;  %v998_v1 = vld [vmem:[%s1258_s1 + $0x1d0] sm:$0xff]  ;;  %v981_v3 = vld [vmem:[%s1258_s1 + $0x148] sm:$0xff]  ;;  %v972_v6 = vld [vmem:[%s1258_s1 + $0x100] sm:$0xff] }
  0x23   :  { %627 = vmatpush.bf16.msrb.mxu1 %v987_v35  ;;  %596 = vmatmul.bf16.vlgmr.msra.gmra.mxu2 %v40_v42  ;;  %v989_v4 = vld [vmem:[%s1258_s1 + $0x188] sm:$0xff]  ;;  %v980_v7 = vld [vmem:[%s1258_s1 + $0x140] sm:$0xff]  ;;  %v28_v12 = vld.sshfl [vmem:[#allocation1 + $0x30] sm:$0xff pattern:$0x73625140] }
  0x24   :  { %640 = vmatpush.bf16.msrb.mxu2 %v995_v40  ;;  %609 = vmatmul.bf16.vlgmr.msra.gmra.mxu3 %v41_v43  ;;  %v997_v5 = vld [vmem:[%s1258_s1 + $0x1c8] sm:$0xff]  ;;  %v988_v8 = vld [vmem:[%s1258_s1 + $0x180] sm:$0xff]  ;;  %v29_v13 = vld.sshfl [vmem:[#allocation1 + $0x38] sm:$0xff pattern:$0x73625140]  ;;  %v44_v16 = vpack.c.bf16 %v28_v12, %v28_v12 }
  0x25   :  { %653 = vmatpush.bf16.msrb.mxu3 %v1003_v41  ;;  %v996_v9 = vld [vmem:[%s1258_s1 + $0x1c0] sm:$0xff]  ;;  %v27_v11 = vld.sshfl [vmem:[#allocation1 + $0x28] sm:$0xff pattern:$0x73625140]  ;;  %v45_v17 = vpack.c.bf16 %v29_v13, %v29_v13 }
  0x26   :  { %615 = vmatpush.bf16.msrb.mxu0 %v978_v46  ;;  %v26_v10 = vld.sshfl [vmem:[#allocation1 + $0x20] sm:$0xff pattern:$0x73625140]  ;;  %v43_v15 = vpack.c.bf16 %v27_v11, %v27_v11 }
  0x27   :  { %628 = vmatpush.bf16.msrb.mxu1 %v986_v47  ;;  %v42_v14 = vpack.c.bf16 %v26_v10, %v26_v10  ;;  %v1005_v24 = vld [vmem:[%s1259_s2] ss:$0 sm:$0xff] }
  0x28   :  { %641 = vmatpush.bf16.msrb.mxu2 %v994_v48 }
  0x29   :  { %654 = vmatpush.bf16.msrb.mxu3 %v1002_v49 }
  0x2a   :  { %616 = vmatpush.bf16.msrb.mxu0 %v977_v50 }
  0x2b   :  { %629 = vmatpush.bf16.msrb.mxu1 %v985_v51 }
  0x2c   :  { %642 = vmatpush.bf16.msrb.mxu2 %v993_v52 }
  0x2d   :  { %655 = vmatpush.bf16.msrb.mxu3 %v1001_v53 }
  0x2e   :  { %617 = vmatpush.bf16.msrb.mxu0 %v976_v54 }
  0x2f   :  { %630 = vmatpush.bf16.msrb.mxu1 %v984_v55 }
  0x30   :  { %643 = vmatpush.bf16.msrb.mxu2 %v992_v56 }
  0x31   :  { %656 = vmatpush.bf16.msrb.mxu3 %v1000_v57 }
  0x32   :  { %618 = vmatpush.bf16.msrb.mxu0 %v975_v58 }
  0x33   :  { %631 = vmatpush.bf16.msrb.mxu1 %v983_v59 }
  0x34   :  { %644 = vmatpush.bf16.msrb.mxu2 %v991_v60 }
  0x35   :  { %657 = vmatpush.bf16.msrb.mxu3 %v999_v61 }
  0x36   :  { %619 = vmatpush.bf16.msrb.mxu0 %v974_v62 }
  0x37   :  { %632 = vmatpush.bf16.msrb.mxu1 %v982_v63 }
  0x38   :  { %645 = vmatpush.bf16.msrb.mxu2 %v990_v0 }
  0x39   :  { %658 = vmatpush.bf16.msrb.mxu3 %v998_v1 }
  0x3a   :  { %620 = vmatpush.bf16.msrb.mxu0 %v973_v2 }
  0x3b   :  { %633 = vmatpush.bf16.msrb.mxu1 %v981_v3 }
  0x3c   :  { %646 = vmatpush.bf16.msrb.mxu2 %v989_v4 }
  0x3d   :  { %659 = vmatpush.bf16.msrb.mxu3 %v997_v5 }
  0x3e   :  { %621 = vmatpush.bf16.msrb.mxu0 %v972_v6 }
  0x3f   :  { %634 = vmatpush.bf16.msrb.mxu1 %v980_v7 }
  0x40   :  { %647 = vmatpush.bf16.msrb.mxu2 %v988_v8 }
  0x41   :  { %660 = vmatpush.bf16.msrb.mxu3 %v996_v9  ;;  %622 = vmatmul.bf16.vlgmr.msrb.gmra.mxu0 %v42_v14 }
  0x42   :  { %635 = vmatmul.bf16.vlgmr.msrb.gmra.mxu1 %v43_v15 }
  0x43   :  { %648 = vmatmul.bf16.vlgmr.msrb.gmra.mxu2 %v44_v16 }
  0x44   :  { %661 = vmatmul.bf16.vlgmr.msrb.gmra.mxu3 %v45_v17 }
  0x9e   :  { %v571_v18 = vpop.f32.mrf.mxu0 }
  0x9f   :  { %v584_v19 = vpop.f32.mrf.mxu1  ;;  %v572_v27 = vadd.f32 %v1005_v24, %v571_v18 }
  0xa1   :  { %v585_v28 = vadd.f32 %v584_v19, %v572_v27 }
  0xa6   :  { %v597_v20 = vpop.f32.mrf.mxu2  ;;  %v573_v22 = vpop.f32.mrf.mxu0 }
  0xa7   :  { %v610_v21 = vpop.f32.mrf.mxu3  ;;  %v586_v23 = vpop.f32.mrf.mxu1  ;;  %v598_v29 = vadd.f32 %v597_v20, %v585_v28 }
  0xa9   :  { %v611_v30 = vadd.f32 %v610_v21, %v598_v29 }
  0xae   :  { %v599_v25 = vpop.f32.mrf.mxu2 }
  0xaf   :  { %v612_v26 = vpop.f32.mrf.mxu3 }
  0xbe   :  { %v623_v31 = vpop.f32.mrf.mxu0 }
  0xbf   :  { %v636_v32 = vpop.f32.mrf.mxu1  ;;  %v624_v33 = vadd.f32 %v623_v31, %v611_v30 }
  0xc1   :  { %v637_v34 = vadd.f32 %v636_v32, %v624_v33 }
  0xc6   :  { %v649_v35 = vpop.f32.mrf.mxu2  ;;  %v625_v38 = vpop.f32.mrf.mxu0 }
  0xc7   :  { %v662_v36 = vpop.f32.mrf.mxu3  ;;  %v650_v37 = vadd.f32 %v649_v35, %v637_v34  ;;  %v638_v39 = vpop.f32.mrf.mxu1 }
  0xc9   :  { %v663_v40 = vadd.f32 %v662_v36, %v650_v37 }
  0xcb   :  { %667 = vst.msk [vmem:[#allocation2] sm:$0x3] %vm666_vm0, %v663_v40 }
  0xcc   :  { %678 = dma.vmem_to_hbm [thread:$0]  %s674_s8, 32, %s676_s11, [#allocation3]  }
  0xce   :  { %v651_v41 = vpop.f32.mrf.mxu2 }
  0xcf   :  { %v664_v42 = vpop.f32.mrf.mxu3 }
  0xd0   :  { %1030 = dma.done.wait [#allocation3], 32  }
  0xd1   :  { %1031 = vsyncadd [#allocation3], 4294967264 }
  0xd2   :  { %683 = vsyncpa [#allocation3], 1 }

</bundles_post_ra>
